<compile_context>
chip_gen: v5e
topology: v5e:2x2
jax: 0.10.0
libtpu: 0.0.40
codegen_flags: <defaults>
</compile_context>

<pallas_src>
import math

import jax
import jax.numpy as jnp
from jax.experimental import pallas as pl
from jax.experimental.pallas import tpu as pltpu

_LANES = 128


def _round_up(v, m):
    return ((v + m - 1) // m) * m


def _linear_kernel(x_ref, w_ref, b_ref, o_ref):
    # x_ref: (TB, D)   w_ref: (D, C_pad)   b_ref: (1, C_pad)   o_ref: (TB, C_pad)
    acc = jnp.dot(x_ref[...], w_ref[...], preferred_element_type=jnp.float32)
    o_ref[...] = (acc + b_ref[...]).astype(o_ref.dtype)


def _pick_batch_tile(B, D, C_pad, tb):
    if tb is None:
        tb = 1024  # fewer grid steps; ~86% of HBM roofline per measured tiled-copy data
    # Guarantee >= 2 grid steps whenever the batch allows so the "parallel" batch axis
    # actually shards across v7x's two TensorCores (negligible cost on 1-TC chips).
    tb = min(tb, _round_up(pl.cdiv(B, 2), 8))
    # Keep the double-buffered x/out tiles + resident weight inside v5e's 16 MiB
    # default scoped-VMEM budget (also leaves ample headroom on v6e/v7x).
    budget = 14 * 1024 * 1024
    resident = 2 * 4 * (D * C_pad + C_pad)   # weight + bias buffers
    per_row = 2 * 4 * (D + C_pad)            # x tile + out tile, double-buffered
    if budget > resident:
        tb_cap = max(8, ((budget - resident) // per_row) // 8 * 8)
    else:
        tb_cap = 8
    # TODO(synk): for very large D the resident (D, C_pad) weight itself can exceed
    #             VMEM; that case needs a K-tiled grid, not just a smaller batch tile.
    return max(8, min(tb, tb_cap))


def prepare_softmaxnet_params(weight, bias):
    """One-time param prep: pad class dim to 128 lanes and pre-transpose to (D, C_pad)."""
    C, D = weight.shape
    C_pad = _round_up(max(C, 1), _LANES)
    w_t_pad = jnp.zeros((D, C_pad), weight.dtype).at[:, :C].set(weight.T)
    b_pad = jnp.zeros((1, C_pad), bias.dtype).at[0, :C].set(bias)
    return w_t_pad, b_pad


def _softmaxnet_forward_padded(x, w_t_pad, b_pad, num_classes, *, tb=None):
    """x: (B, ...) f32; w_t_pad: (D, C_pad); b_pad: (1, C_pad).  Returns (B, num_classes)."""
    B = x.shape[0]
    D = math.prod(x.shape[1:])          # static python int
    C_pad = w_t_pad.shape[1]
    assert w_t_pad.shape[0] == D

    x_flat = x.reshape(B, D)             # matches torch x.view(x.size(0), -1)

    tb = _pick_batch_tile(B, D, C_pad, tb)
    num_tiles = pl.cdiv(B, tb)           # ragged last x tile is clipped by Pallas; no jnp.pad
    B_out = num_tiles * tb               # full-tile (unmasked, lane-dense) output stores

    cost = pl.CostEstimate(
        flops=2 * B * D * C_pad,
        transcendentals=0,
        bytes_accessed=4 * (B * D + D * C_pad + B * C_pad),
    )

    out = pl.pallas_call(
        _linear_kernel,
        out_shape=jax.ShapeDtypeStruct((B_out, C_pad), x.dtype),
        grid_spec=pltpu.PrefetchScalarGridSpec(
            num_scalar_prefetch=0,
            grid=(num_tiles,),
            in_specs=[
                pl.BlockSpec((tb, D), lambda i: (i, 0)),        # x tile streams over batch
                pl.BlockSpec((D, C_pad), lambda i: (0, 0)),     # weight resident across grid
                pl.BlockSpec((1, C_pad), lambda i: (0, 0)),     # bias resident across grid
            ],
            out_specs=pl.BlockSpec((tb, C_pad), lambda i: (i, 0)),
        ),
        compiler_params=pltpu.CompilerParams(
            # Batch axis is independent work -> "parallel" (shards across TCs on v7x).
            dimension_semantics=("parallel",),
        ),
        cost_estimate=cost,
    )(x_flat, w_t_pad, b_pad)

    return out[:B, :num_classes]


def make_softmaxnet_forward(weight, bias, *, tb=None):
    """Pad/transpose params once and return a jitted forward(x) closure."""
    num_classes = weight.shape[0]
    w_t_pad, b_pad = prepare_softmaxnet_params(weight, bias)

    @jax.jit
    def forward(x):
        return _softmaxnet_forward_padded(x, w_t_pad, b_pad, num_classes, tb=tb)

    return forward


def softmaxnet_forward(x, weight, bias, *, tb=None):
    """Convenience one-shot entry point (pads params on the fly)."""
    w_t_pad, b_pad = prepare_softmaxnet_params(weight, bias)
    return _softmaxnet_forward_padded(x, w_t_pad, b_pad, weight.shape[0], tb=tb)


if __name__ == "__main__":
    key = jax.random.PRNGKey(0)
    k_x, k_w, k_b = jax.random.split(key, 3)

    # Small shapes consistent with the module: x (B, C_in, H, W), D = C_in*H*W, C classes.
    B, C_in, H, W = 2, 4, 16, 16
    D = C_in * H * W          # 1024
    C = 10                    # number of classes

    x = jax.random.normal(k_x, (B, C_in, H, W), dtype=jnp.float32)

    # Deterministic param init mimicking nn.Linear default: U(-1/sqrt(D), 1/sqrt(D))
    bound = 1.0 / (D ** 0.5)
    weight = jax.random.uniform(k_w, (C, D), minval=-bound, maxval=bound,
                                dtype=jnp.float32)
    bias = jax.random.uniform(k_b, (C,), minval=-bound, maxval=bound,
                              dtype=jnp.float32)

    fwd = make_softmaxnet_forward(weight, bias)   # params padded/transposed once
    y = fwd(x)
    jax.block_until_ready(y)

    # Reference check in plain JAX
    y_ref = x.reshape(B, -1) @ weight.T + bias
    assert y.shape == (B, C)
    assert jnp.allclose(y, y_ref, atol=1e-4, rtol=1e-4)

    print("KERNEL_OK")
</pallas_src>

<mosaic_0001>
module attributes {stable_mosaic.version = 11 : i64} {
  func.func @_linear_kernel(%arg0: i32, %arg1: memref<8x1024xf32, #tpu.memory_space<vmem>>, %arg2: memref<1024x128xf32, #tpu.memory_space<vmem>>, %arg3: memref<1x128xf32, #tpu.memory_space<vmem>>, %arg4: memref<8x128xf32, #tpu.memory_space<vmem>>) attributes {dimension_semantics = [#tpu.dimension_semantics<parallel>], iteration_bounds = array<i64: 1>, scalar_prefetch = 0 : i64, scratch_operands = 0 : i64, tpu.core_type = #tpu.core_type<tc>, window_params = [{transform_indices = @transform_0, window_bounds = array<i64: 8, 1024>}, {pipeline_mode = #tpu.pipeline_mode<synchronous>, transform_indices = @transform_1, window_bounds = array<i64: 1024, 128>}, {pipeline_mode = #tpu.pipeline_mode<synchronous>, transform_indices = @transform_2, window_bounds = array<i64: 1, 128>}, {transform_indices = @transform_3, window_bounds = array<i64: 8, 128>}]} {
    %c0 = arith.constant 0 : index
    %c0_0 = arith.constant 0 : index
    %0 = vector.load %arg1[%c0, %c0_0] : memref<8x1024xf32, #tpu.memory_space<vmem>>, vector<8x1024xf32>
    %c0_1 = arith.constant 0 : index
    %c0_2 = arith.constant 0 : index
    %1 = vector.load %arg2[%c0_1, %c0_2] : memref<1024x128xf32, #tpu.memory_space<vmem>>, vector<1024x128xf32>
    %cst = arith.constant dense<0.000000e+00> : vector<8x128xf32>
    %2 = tpu.matmul %0, %1, %cst {dimension_numbers = #tpu.dot_dimension_numbers<[1], [0], [0], [1], [0, 0, 1, 1], [], []>} : vector<8x1024xf32>, vector<1024x128xf32>, vector<8x128xf32> -> vector<8x128xf32>
    %c0_3 = arith.constant 0 : index
    %c0_4 = arith.constant 0 : index
    %3 = vector.load %arg3[%c0_3, %c0_4] : memref<1x128xf32, #tpu.memory_space<vmem>>, vector<1x128xf32>
    %4 = vector.broadcast %3 : vector<1x128xf32> to vector<8x128xf32>
    %5 = arith.addf %2, %4 : vector<8x128xf32>
    %c0_5 = arith.constant 0 : index
    %c0_6 = arith.constant 0 : index
    %6 = vector.load %arg4[%c0_5, %c0_6] : memref<8x128xf32, #tpu.memory_space<vmem>>, vector<8x128xf32>
    tpu.vector_store %arg4[%c0_5, %c0_6], %5 {strides = array<i32>} : memref<8x128xf32, #tpu.memory_space<vmem>>, vector<8x128xf32>,
    return
  }
  func.func @transform_0(%arg0: i32) -> (i32, i32) {
    %c0_i32 = arith.constant 0 : i32
    %c0_i32_0 = arith.constant 0 : i32
    return %arg0, %c0_i32 : i32, i32
  }
  func.func @transform_1(%arg0: i32) -> (i32, i32) {
    %c0_i32 = arith.constant 0 : i32
    %c0_i32_0 = arith.constant 0 : i32
    %c0_i32_1 = arith.constant 0 : i32
    return %c0_i32, %c0_i32_0 : i32, i32
  }
  func.func @transform_2(%arg0: i32) -> (i32, i32) {
    %c0_i32 = arith.constant 0 : i32
    %c0_i32_0 = arith.constant 0 : i32
    %c0_i32_1 = arith.constant 0 : i32
    return %c0_i32, %c0_i32_0 : i32, i32
  }
  func.func @transform_3(%arg0: i32) -> (i32, i32) {
    %c0_i32 = arith.constant 0 : i32
    %c0_i32_0 = arith.constant 0 : i32
    return %arg0, %c0_i32 : i32, i32
  }
}

</mosaic_0001>

<bundles_post_ra>
// kernel: forward.1
= control target key start
LH: loop header
LB: loop body
LE: loop exit
PB: predicated region body
PF: predicated region fallthrough
CT: control target
= control target key end

     0   :  { %8 = vsyncpa [#allocation3], 0  ;;  %s405_s15 = smov [#allocation2]   ;;  %s406_s17 = smov 128   ;;  %s461_s0 = inlined_call_operand.vmem [shape: f32[2,1024], index: 0, kind: input, shape index: {}]   ;;  %s462_s1 = inlined_call_operand.hbm [shape: f32[1024,128], index: 1, kind: input, shape index: {}]   ;;  %s463_s2 = inlined_call_operand.vmem [shape: f32[1,128], index: 2, kind: input, shape index: {}]   ;;  %s464_s3 = inlined_call_operand.vmem [shape: f32[8,128], index: 3, kind: output, shape index: {}]  }
   0x1   :  { %s15_s14 = sshll.u32 %s462_s1, 4  ;;  %s17_s16 = sshll.u32 %s405_s15, 4  ;;  %s16_s14 = int_to_ptr.hbm [resolvable:$true] %s15_s14  ;;  %s18_s16 = int_to_ptr.vmem [resolvable:$true] %s17_s16 }
   0x2   :  { %s407_s18 = smov 8  }
   0x3   :  { %23 = dma.hbm_to_vmem [thread:$0]  %s16_s14, 16384, %s18_s16, [#allocation3], %s406_s17, %s406_s17, %s407_s18  }
   0x4   :  { %403 = dma.done.wait [#allocation3], 16384  }
   0x5   :  { %404 = vsyncadd [#allocation3], 4294950912  ;;  %v85_v0 = vld [vmem:[#allocation2 + $0x178] sm:$0xff]  ;;  %v84_v2 = vld [vmem:[#allocation2 + $0x170] sm:$0xff] }
   0x6   :  { %v53_v1 = vld [vmem:[#allocation2 + $0x78] sm:$0xff]  ;;  %249 = vmatpush.msra.mxu2 %v85_v0  ;;  %v52_v4 = vld [vmem:[#allocation2 + $0x70] sm:$0xff]  ;;  %v83_v6 = vld [vmem:[#allocation2 + $0x168] sm:$0xff] }
   0x7   :  { %209 = vmatpush.msra.mxu0 %v53_v1  ;;  %v101_v3 = vld [vmem:[#allocation2 + $0x1f8] sm:$0xff]  ;;  %v100_v7 = vld [vmem:[#allocation2 + $0x1f0] sm:$0xff]  ;;  %v51_v8 = vld [vmem:[#allocation2 + $0x68] sm:$0xff] }
   0x8   :  { %v69_v5 = vld [vmem:[#allocation2 + $0xf8] sm:$0xff]  ;;  %269 = vmatpush.msra.mxu3 %v101_v3  ;;  %250 = vmatpush.msra.mxu2 %v84_v2  ;;  %v68_v9 = vld [vmem:[#allocation2 + $0xf0] sm:$0xff]  ;;  %v99_v10 = vld [vmem:[#allocation2 + $0x1e8] sm:$0xff] }
   0x9   :  { %229 = vmatpush.msra.mxu1 %v69_v5  ;;  %210 = vmatpush.msra.mxu0 %v52_v4  ;;  %v82_v11 = vld [vmem:[#allocation2 + $0x160] sm:$0xff]  ;;  %v67_v13 = vld [vmem:[#allocation2 + $0xe8] sm:$0xff]  ;;  %v81_v16 = vld [vmem:[#allocation2 + $0x158] sm:$0xff] }
   0xa   :  { %270 = vmatpush.msra.mxu3 %v100_v7  ;;  %v50_v12 = vld [vmem:[#allocation2 + $0x60] sm:$0xff]  ;;  %251 = vmatpush.msra.mxu2 %v83_v6  ;;  %v49_v17 = vld [vmem:[#allocation2 + $0x58] sm:$0xff]  ;;  %v80_v20 = vld [vmem:[#allocation2 + $0x150] sm:$0xff] }
   0xb   :  { %230 = vmatpush.msra.mxu1 %v68_v9  ;;  %211 = vmatpush.msra.mxu0 %v51_v8  ;;  %v98_v14 = vld [vmem:[#allocation2 + $0x1e0] sm:$0xff]  ;;  %v97_v18 = vld [vmem:[#allocation2 + $0x1d8] sm:$0xff]  ;;  %v48_v21 = vld [vmem:[#allocation2 + $0x50] sm:$0xff] }
   0xc   :  { %v66_v15 = vld [vmem:[#allocation2 + $0xe0] sm:$0xff]  ;;  %271 = vmatpush.msra.mxu3 %v99_v10  ;;  %252 = vmatpush.msra.mxu2 %v82_v11  ;;  %v65_v19 = vld [vmem:[#allocation2 + $0xd8] sm:$0xff]  ;;  %v96_v22 = vld [vmem:[#allocation2 + $0x1d0] sm:$0xff] }
   0xd   :  { %231 = vmatpush.msra.mxu1 %v67_v13  ;;  %212 = vmatpush.msra.mxu0 %v50_v12  ;;  %v64_v23 = vld [vmem:[#allocation2 + $0xd0] sm:$0xff]  ;;  %v79_v24 = vld [vmem:[#allocation2 + $0x148] sm:$0xff]  ;;  %v78_v28 = vld [vmem:[#allocation2 + $0x140] sm:$0xff] }
   0xe   :  { %272 = vmatpush.msra.mxu3 %v98_v14  ;;  %253 = vmatpush.msra.mxu2 %v81_v16  ;;  %v47_v25 = vld [vmem:[#allocation2 + $0x48] sm:$0xff]  ;;  %v46_v29 = vld [vmem:[#allocation2 + $0x40] sm:$0xff]  ;;  %v77_v32 = vld [vmem:[#allocation2 + $0x138] sm:$0xff] }
   0xf   :  { %232 = vmatpush.msra.mxu1 %v66_v15  ;;  %213 = vmatpush.msra.mxu0 %v49_v17  ;;  %v95_v26 = vld [vmem:[#allocation2 + $0x1c8] sm:$0xff]  ;;  %v94_v30 = vld [vmem:[#allocation2 + $0x1c0] sm:$0xff]  ;;  %v45_v33 = vld [vmem:[#allocation2 + $0x38] sm:$0xff] }
  0x10   :  { %273 = vmatpush.msra.mxu3 %v97_v18  ;;  %254 = vmatpush.msra.mxu2 %v80_v20  ;;  %v63_v27 = vld [vmem:[#allocation2 + $0xc8] sm:$0xff]  ;;  %v62_v31 = vld [vmem:[#allocation2 + $0xc0] sm:$0xff]  ;;  %v93_v34 = vld [vmem:[#allocation2 + $0x1b8] sm:$0xff] }
  0x11   :  { %233 = vmatpush.msra.mxu1 %v65_v19  ;;  %214 = vmatpush.msra.mxu0 %v48_v21  ;;  %v61_v35 = vld [vmem:[#allocation2 + $0xb8] sm:$0xff]  ;;  %v76_v36 = vld [vmem:[#allocation2 + $0x130] sm:$0xff]  ;;  %v75_v40 = vld [vmem:[#allocation2 + $0x128] sm:$0xff] }
  0x12   :  { %274 = vmatpush.msra.mxu3 %v96_v22  ;;  %255 = vmatpush.msra.mxu2 %v79_v24  ;;  %v44_v37 = vld [vmem:[#allocation2 + $0x30] sm:$0xff]  ;;  %v43_v41 = vld [vmem:[#allocation2 + $0x28] sm:$0xff]  ;;  %v74_v44 = vld [vmem:[#allocation2 + $0x120] sm:$0xff] }
  0x13   :  { %234 = vmatpush.msra.mxu1 %v64_v23  ;;  %215 = vmatpush.msra.mxu0 %v47_v25  ;;  %v92_v38 = vld [vmem:[#allocation2 + $0x1b0] sm:$0xff]  ;;  %v91_v42 = vld [vmem:[#allocation2 + $0x1a8] sm:$0xff]  ;;  %v42_v45 = vld [vmem:[#allocation2 + $0x20] sm:$0xff] }
  0x14   :  { %275 = vmatpush.msra.mxu3 %v95_v26  ;;  %256 = vmatpush.msra.mxu2 %v78_v28  ;;  %v60_v39 = vld [vmem:[#allocation2 + $0xb0] sm:$0xff]  ;;  %v59_v43 = vld [vmem:[#allocation2 + $0xa8] sm:$0xff]  ;;  %v90_v46 = vld [vmem:[#allocation2 + $0x1a0] sm:$0xff] }
  0x15   :  { %235 = vmatpush.msra.mxu1 %v63_v27  ;;  %216 = vmatpush.msra.mxu0 %v46_v29  ;;  %v58_v47 = vld [vmem:[#allocation2 + $0xa0] sm:$0xff]  ;;  %v73_v48 = vld [vmem:[#allocation2 + $0x118] sm:$0xff]  ;;  %v72_v52 = vld [vmem:[#allocation2 + $0x110] sm:$0xff] }
  0x16   :  { %276 = vmatpush.msra.mxu3 %v94_v30  ;;  %257 = vmatpush.msra.mxu2 %v77_v32  ;;  %v41_v49 = vld [vmem:[#allocation2 + $0x18] sm:$0xff]  ;;  %v40_v53 = vld [vmem:[#allocation2 + $0x10] sm:$0xff]  ;;  %v71_v56 = vld [vmem:[#allocation2 + $0x108] sm:$0xff] }
  0x17   :  { %236 = vmatpush.msra.mxu1 %v62_v31  ;;  %217 = vmatpush.msra.mxu0 %v45_v33  ;;  %v89_v50 = vld [vmem:[#allocation2 + $0x198] sm:$0xff]  ;;  %v88_v54 = vld [vmem:[#allocation2 + $0x190] sm:$0xff]  ;;  %v39_v57 = vld [vmem:[#allocation2 + $0x8] sm:$0xff] }
  0x18   :  { %277 = vmatpush.msra.mxu3 %v93_v34  ;;  %258 = vmatpush.msra.mxu2 %v76_v36  ;;  %v57_v51 = vld [vmem:[#allocation2 + $0x98] sm:$0xff]  ;;  %v56_v55 = vld [vmem:[#allocation2 + $0x90] sm:$0xff]  ;;  %v87_v58 = vld [vmem:[#allocation2 + $0x188] sm:$0xff] }
  0x19   :  { %237 = vmatpush.msra.mxu1 %v61_v35  ;;  %218 = vmatpush.msra.mxu0 %v44_v37  ;;  %v55_v59 = vld [vmem:[#allocation2 + $0x88] sm:$0xff]  ;;  %v70_v60 = vld [vmem:[#allocation2 + $0x100] sm:$0xff]  ;;  %v149_v62 = vld [vmem:[#allocation2 + $0x378] sm:$0xff] }
  0x1a   :  { %278 = vmatpush.msra.mxu3 %v92_v38  ;;  %259 = vmatpush.msra.mxu2 %v75_v40  ;;  %v38_v61 = vld [vmem:[#allocation2] sm:$0xff]  ;;  %v117_v0 = vld [vmem:[#allocation2 + $0x278] sm:$0xff]  ;;  %v148_v2 = vld [vmem:[#allocation2 + $0x370] sm:$0xff] }
  0x1b   :  { %238 = vmatpush.msra.mxu1 %v60_v39  ;;  %219 = vmatpush.msra.mxu0 %v43_v41  ;;  %v86_v63 = vld [vmem:[#allocation2 + $0x180] sm:$0xff]  ;;  %v165_v1 = vld [vmem:[#allocation2 + $0x3f8] sm:$0xff]  ;;  %v116_v4 = vld [vmem:[#allocation2 + $0x270] sm:$0xff] }
  0x1c   :  { %279 = vmatpush.msra.mxu3 %v91_v42  ;;  %260 = vmatpush.msra.mxu2 %v74_v44  ;;  %v54_v3 = vld [vmem:[#allocation2 + $0x80] sm:$0xff]  ;;  %v133_v5 = vld [vmem:[#allocation2 + $0x2f8] sm:$0xff]  ;;  %v147_v6 = vld [vmem:[#allocation2 + $0x368] sm:$0xff] }
  0x1d   :  { %239 = vmatpush.msra.mxu1 %v59_v43  ;;  %220 = vmatpush.msra.mxu0 %v42_v45  ;;  %v164_v7 = vld [vmem:[#allocation2 + $0x3f0] sm:$0xff]  ;;  %v115_v8 = vld [vmem:[#allocation2 + $0x268] sm:$0xff]  ;;  %v146_v10 = vld [vmem:[#allocation2 + $0x360] sm:$0xff] }
  0x1e   :  { %280 = vmatpush.msra.mxu3 %v90_v46  ;;  %261 = vmatpush.msra.mxu2 %v73_v48  ;;  %v132_v9 = vld [vmem:[#allocation2 + $0x2f0] sm:$0xff]  ;;  %v163_v11 = vld [vmem:[#allocation2 + $0x3e8] sm:$0xff]  ;;  %v114_v12 = vld [vmem:[#allocation2 + $0x260] sm:$0xff] }
  0x1f   :  { %240 = vmatpush.msra.mxu1 %v58_v47  ;;  %221 = vmatpush.msra.mxu0 %v41_v49  ;;  %v131_v13 = vld [vmem:[#allocation2 + $0x2e8] sm:$0xff]  ;;  %v30_v14 = vld [vmem:[%s461_s0] sm:$0xff]  ;;  %v162_v18 = vld [vmem:[#allocation2 + $0x3e0] sm:$0xff] }
  0x20   :  { %281 = vmatpush.msra.mxu3 %v89_v50  ;;  %262 = vmatpush.msra.mxu2 %v72_v52  ;;  %v32_v15 = vld [vmem:[%s461_s0 + $0x10] sm:$0xff]  ;;  %v34_v16 = vld [vmem:[%s461_s0 + $0x20] sm:$0xff]  ;;  %178 = vst [vmem:[#allocation1] ss:$4 sm:$0xff] %v30_v14  ;;  %v130_v21 = vld [vmem:[#allocation2 + $0x2e0] sm:$0xff] }
  0x21   :  { %241 = vmatpush.msra.mxu1 %v57_v51  ;;  %222 = vmatpush.msra.mxu0 %v40_v53  ;;  %v145_v17 = vld [vmem:[#allocation2 + $0x358] sm:$0xff]  ;;  %v36_v19 = vld [vmem:[%s461_s0 + $0x30] sm:$0xff]  ;;  %180 = vst [vmem:[#allocation1 + $0x1] ss:$4 sm:$0xff] %v32_v15  ;;  %v144_v22 = vld [vmem:[#allocation2 + $0x350] sm:$0xff] }
  0x22   :  { %282 = vmatpush.msra.mxu3 %v88_v54  ;;  %263 = vmatpush.msra.mxu2 %v71_v56  ;;  %v113_v20 = vld [vmem:[#allocation2 + $0x258] sm:$0xff]  ;;  %182 = vst [vmem:[#allocation1 + $0x2] ss:$4 sm:$0xff] %v34_v16  ;;  %v112_v24 = vld [vmem:[#allocation2 + $0x250] sm:$0xff]  ;;  %v143_v26 = vld [vmem:[#allocation2 + $0x348] sm:$0xff] }
  0x23   :  { %242 = vmatpush.msra.mxu1 %v56_v55  ;;  %223 = vmatpush.msra.mxu0 %v39_v57  ;;  %v161_v23 = vld [vmem:[#allocation2 + $0x3d8] sm:$0xff]  ;;  %184 = vst [vmem:[#allocation1 + $0x3] ss:$4 sm:$0xff] %v36_v19  ;;  %v160_v27 = vld [vmem:[#allocation2 + $0x3d0] sm:$0xff]  ;;  %v111_v28 = vld [vmem:[#allocation2 + $0x248] sm:$0xff] }
  0x24   :  { %283 = vmatpush.msra.mxu3 %v87_v58  ;;  %264 = vmatpush.msra.mxu2 %v70_v60  ;;  %v129_v25 = vld [vmem:[#allocation2 + $0x2d8] sm:$0xff]  ;;  %v128_v29 = vld [vmem:[#allocation2 + $0x2d0] sm:$0xff]  ;;  %v142_v30 = vld [vmem:[#allocation2 + $0x340] sm:$0xff] }
  0x25   :  { %243 = vmatpush.msra.mxu1 %v55_v59  ;;  %224 = vmatpush.msra.mxu0 %v38_v61  ;;  %v159_v31 = vld [vmem:[#allocation2 + $0x3c8] sm:$0xff]  ;;  %v31_v32 = vld [vmem:[%s461_s0 + $0x8] sm:$0xff]  ;;  %v33_v33 = vld [vmem:[%s461_s0 + $0x18] sm:$0xff] }
  0x26   :  { %329 = vmatpush.msrb.mxu2 %v149_v62  ;;  %284 = vmatpush.msra.mxu3 %v86_v63  ;;  %v35_v34 = vld [vmem:[%s461_s0 + $0x28] sm:$0xff]  ;;  %v37_v35 = vld [vmem:[%s461_s0 + $0x38] sm:$0xff]  ;;  %186 = vst [vmem:[#allocation1 + $0x20] ss:$4 sm:$0xff] %v31_v32  ;;  %v127_v37 = vld [vmem:[#allocation2 + $0x2c8] sm:$0xff] }
  0x27   :  { %289 = vmatpush.msrb.mxu0 %v117_v0  ;;  %244 = vmatpush.msra.mxu1 %v54_v3  ;;  %v110_v36 = vld [vmem:[#allocation2 + $0x240] sm:$0xff]  ;;  %188 = vst [vmem:[#allocation1 + $0x21] ss:$4 sm:$0xff] %v33_v33  ;;  %v141_v38 = vld [vmem:[#allocation2 + $0x338] sm:$0xff]  ;;  %v140_v42 = vld [vmem:[#allocation2 + $0x330] sm:$0xff] }
  0x28   :  { %349 = vmatpush.msrb.mxu3 %v165_v1  ;;  %330 = vmatpush.msrb.mxu2 %v148_v2  ;;  %v158_v39 = vld [vmem:[#allocation2 + $0x3c0] sm:$0xff]  ;;  %190 = vst [vmem:[#allocation1 + $0x22] ss:$4 sm:$0xff] %v35_v34  ;;  %v109_v40 = vld [vmem:[#allocation2 + $0x238] sm:$0xff]  ;;  %v108_v44 = vld [vmem:[#allocation2 + $0x230] sm:$0xff] }
  0x29   :  { %290 = vmatpush.msrb.mxu0 %v116_v4  ;;  %309 = vmatpush.msrb.mxu1 %v133_v5  ;;  %v126_v41 = vld [vmem:[#allocation2 + $0x2c0] sm:$0xff]  ;;  %192 = vst [vmem:[#allocation1 + $0x23] ss:$4 sm:$0xff] %v37_v35  ;;  %v157_v43 = vld [vmem:[#allocation2 + $0x3b8] sm:$0xff]  ;;  %v139_v46 = vld [vmem:[#allocation2 + $0x328] sm:$0xff] }
  0x2a   :  { %331 = vmatpush.msrb.mxu2 %v147_v6  ;;  %350 = vmatpush.msrb.mxu3 %v164_v7  ;;  %v125_v45 = vld [vmem:[#allocation2 + $0x2b8] sm:$0xff]  ;;  %v156_v47 = vld [vmem:[#allocation2 + $0x3b0] sm:$0xff]  ;;  %v107_v48 = vld [vmem:[#allocation2 + $0x228] sm:$0xff] }
  0x2b   :  { %291 = vmatpush.msrb.mxu0 %v115_v8  ;;  %310 = vmatpush.msrb.mxu1 %v132_v9  ;;  %v124_v49 = vld [vmem:[#allocation2 + $0x2b0] sm:$0xff]  ;;  %v138_v50 = vld [vmem:[#allocation2 + $0x320] sm:$0xff]  ;;  %v155_v51 = vld [vmem:[#allocation2 + $0x3a8] sm:$0xff] }
  0x2c   :  { %332 = vmatpush.msrb.mxu2 %v146_v10  ;;  %351 = vmatpush.msrb.mxu3 %v163_v11  ;;  %v195_v52 = vld.sshfl [vmem:[#allocation1 + $0x10] sm:$0xff pattern:$0x73625140]  ;;  %v106_v53 = vld [vmem:[#allocation2 + $0x220] sm:$0xff]  ;;  %v137_v55 = vld [vmem:[#allocation2 + $0x318] sm:$0xff] }
  0x2d   :  { %292 = vmatpush.msrb.mxu0 %v114_v12  ;;  %311 = vmatpush.msrb.mxu1 %v131_v13  ;;  %v123_v54 = vld [vmem:[#allocation2 + $0x2a8] sm:$0xff]  ;;  %v154_v56 = vld [vmem:[#allocation2 + $0x3a0] sm:$0xff]  ;;  %v193_v57 = vld.sshfl [vmem:[#allocation1] sm:$0xff pattern:$0x73625140] }
  0x2e   :  { %333 = vmatpush.msrb.mxu2 %v145_v17  ;;  %352 = vmatpush.msrb.mxu3 %v162_v18  ;;  %v196_v58 = vld.sshfl [vmem:[#allocation1 + $0x18] sm:$0xff pattern:$0x73625140]  ;;  %v105_v59 = vld [vmem:[#allocation2 + $0x218] sm:$0xff]  ;;  %v122_v60 = vld [vmem:[#allocation2 + $0x2a0] sm:$0xff] }
  0x2f   :  { %293 = vmatpush.msrb.mxu0 %v113_v20  ;;  %312 = vmatpush.msrb.mxu1 %v130_v21  ;;  %v136_v61 = vld [vmem:[#allocation2 + $0x310] sm:$0xff]  ;;  %v153_v62 = vld [vmem:[#allocation2 + $0x398] sm:$0xff]  ;;  %v194_v63 = vld.sshfl [vmem:[#allocation1 + $0x8] sm:$0xff pattern:$0x73625140] }
  0x30   :  { %334 = vmatpush.msrb.mxu2 %v144_v22  ;;  %353 = vmatpush.msrb.mxu3 %v161_v23  ;;  %v104_v0 = vld [vmem:[#allocation2 + $0x210] sm:$0xff]  ;;  %v121_v1 = vld [vmem:[#allocation2 + $0x298] sm:$0xff]  ;;  %v135_v2 = vld [vmem:[#allocation2 + $0x308] sm:$0xff] }
  0x31   :  { %294 = vmatpush.msrb.mxu0 %v112_v24  ;;  %313 = vmatpush.msrb.mxu1 %v129_v25  ;;  %v152_v3 = vld [vmem:[#allocation2 + $0x390] sm:$0xff]  ;;  %v103_v4 = vld [vmem:[#allocation2 + $0x208] sm:$0xff]  ;;  %v134_v6 = vld [vmem:[#allocation2 + $0x300] sm:$0xff] }
  0x32   :  { %335 = vmatpush.msrb.mxu2 %v143_v26  ;;  %354 = vmatpush.msrb.mxu3 %v160_v27  ;;  %v120_v5 = vld [vmem:[#allocation2 + $0x290] sm:$0xff]  ;;  %v151_v7 = vld [vmem:[#allocation2 + $0x388] sm:$0xff]  ;;  %v102_v9 = vld [vmem:[#allocation2 + $0x200] sm:$0xff] }
  0x33   :  { %295 = vmatpush.msrb.mxu0 %v111_v28  ;;  %314 = vmatpush.msrb.mxu1 %v128_v29  ;;  %v199_v8 = vld.sshfl [vmem:[#allocation1 + $0x30] sm:$0xff pattern:$0x73625140]  ;;  %v150_v11 = vld [vmem:[#allocation2 + $0x380] sm:$0xff]  ;;  %v378_v16 = vld [vmem:[%s463_s2] ss:$0 sm:$0xff] }
  0x34   :  { %336 = vmatpush.msrb.mxu2 %v142_v30  ;;  %355 = vmatpush.msrb.mxu3 %v159_v31  ;;  %v119_v10 = vld [vmem:[#allocation2 + $0x288] sm:$0xff]  ;;  %v197_v12 = vld.sshfl [vmem:[#allocation1 + $0x20] sm:$0xff pattern:$0x73625140]  ;;  %v118_v14 = vld [vmem:[#allocation2 + $0x280] sm:$0xff] }
  0x35   :  { %296 = vmatpush.msrb.mxu0 %v110_v36  ;;  %315 = vmatpush.msrb.mxu1 %v127_v37  ;;  %v200_v13 = vld.sshfl [vmem:[#allocation1 + $0x38] sm:$0xff pattern:$0x73625140]  ;;  %v198_v15 = vld.sshfl [vmem:[#allocation1 + $0x28] sm:$0xff pattern:$0x73625140] }
  0x36   :  { %337 = vmatpush.msrb.mxu2 %v141_v38  ;;  %356 = vmatpush.msrb.mxu3 %v158_v39 }
  0x37   :  { %297 = vmatpush.msrb.mxu0 %v109_v40  ;;  %316 = vmatpush.msrb.mxu1 %v126_v41 }
  0x38   :  { %338 = vmatpush.msrb.mxu2 %v140_v42  ;;  %357 = vmatpush.msrb.mxu3 %v157_v43 }
  0x39   :  { %298 = vmatpush.msrb.mxu0 %v108_v44  ;;  %317 = vmatpush.msrb.mxu1 %v125_v45 }
  0x3a   :  { %339 = vmatpush.msrb.mxu2 %v139_v46  ;;  %358 = vmatpush.msrb.mxu3 %v156_v47 }
  0x3b   :  { %299 = vmatpush.msrb.mxu0 %v107_v48  ;;  %318 = vmatpush.msrb.mxu1 %v124_v49 }
  0x3c   :  { %340 = vmatpush.msrb.mxu2 %v138_v50  ;;  %359 = vmatpush.msrb.mxu3 %v155_v51 }
  0x3d   :  { %265 = vmatmul.f32.vlgmr.msra.gmra.mxu2 %v195_v52  ;;  %300 = vmatpush.msrb.mxu0 %v106_v53 }
  0x3e   :  { %319 = vmatpush.msrb.mxu1 %v123_v54  ;;  %341 = vmatpush.msrb.mxu2 %v137_v55 }
  0x3f   :  { %360 = vmatpush.msrb.mxu3 %v154_v56  ;;  %225 = vmatmul.f32.vlgmr.msra.gmra.mxu0 %v193_v57 }
  0x40   :  { %285 = vmatmul.f32.vlgmr.msra.gmra.mxu3 %v196_v58  ;;  %301 = vmatpush.msrb.mxu0 %v105_v59 }
  0x41   :  { %320 = vmatpush.msrb.mxu1 %v122_v60  ;;  %342 = vmatpush.msrb.mxu2 %v136_v61 }
  0x42   :  { %361 = vmatpush.msrb.mxu3 %v153_v62  ;;  %245 = vmatmul.f32.vlgmr.msra.gmra.mxu1 %v194_v63 }
  0x43   :  { %302 = vmatpush.msrb.mxu0 %v104_v0  ;;  %321 = vmatpush.msrb.mxu1 %v121_v1 }
  0x44   :  { %343 = vmatpush.msrb.mxu2 %v135_v2  ;;  %362 = vmatpush.msrb.mxu3 %v152_v3 }
  0x45   :  { %303 = vmatpush.msrb.mxu0 %v103_v4  ;;  %322 = vmatpush.msrb.mxu1 %v120_v5 }
  0x46   :  { %344 = vmatpush.msrb.mxu2 %v134_v6  ;;  %363 = vmatpush.msrb.mxu3 %v151_v7 }
  0x47   :  { %345 = vmatmul.f32.vlgmr.msrb.gmra.mxu2 %v199_v8  ;;  %304 = vmatpush.msrb.mxu0 %v102_v9 }
  0x48   :  { %323 = vmatpush.msrb.mxu1 %v119_v10  ;;  %364 = vmatpush.msrb.mxu3 %v150_v11 }
  0x49   :  { %305 = vmatmul.f32.vlgmr.msrb.gmra.mxu0 %v197_v12  ;;  %365 = vmatmul.f32.vlgmr.msrb.gmra.mxu3 %v200_v13 }
  0x4a   :  { %324 = vmatpush.msrb.mxu1 %v118_v14 }
  0x4b   :  { %325 = vmatmul.f32.vlgmr.msrb.gmra.mxu1 %v198_v15 }
  0xbc   :  { %v226_v17 = vpop.f32.mrf.mxu0 }
  0xbd   :  { %v227_v18 = vadd.f32 %v378_v16, %v226_v17 }
  0xbf   :  { %v246_v19 = vpop.f32.mrf.mxu1 }
  0xc0   :  { %v247_v20 = vadd.f32 %v246_v19, %v227_v18  ;;  %v266_v21 = vpop.f32.mrf.mxu2 }
  0xc2   :  { %v267_v22 = vadd.f32 %v266_v21, %v247_v20 }
  0xc3   :  { %v286_v23 = vpop.f32.mrf.mxu3 }
  0xc4   :  { %v287_v24 = vadd.f32 %v286_v23, %v267_v22 }
  0xc6   :  { %v306_v25 = vpop.f32.mrf.mxu0 }
  0xc7   :  { %v307_v26 = vadd.f32 %v306_v25, %v287_v24 }
  0xc8   :  { %v326_v27 = vpop.f32.mrf.mxu1 }
  0xc9   :  { %v327_v28 = vadd.f32 %v326_v27, %v307_v26 }
  0xca   :  { %v346_v29 = vpop.f32.mrf.mxu2 }
  0xcb   :  { %v347_v30 = vadd.f32 %v346_v29, %v327_v28 }
  0xcc   :  { %v366_v31 = vpop.f32.mrf.mxu3 }
  0xcd   :  { %v367_v32 = vadd.f32 %v366_v31, %v347_v30 }
  0xcf   :  { %369 = vst [vmem:[%s464_s3] sm:$0xff] %v367_v32 }
  0xd0   :  { %374 = vsyncpa [#allocation3], 1 }

</bundles_post_ra>
